<compile_context>
chip_gen: v7x
topology: tpu7x:2x2x1
jax: 0.10.0
libtpu: 0.0.40
codegen_flags: <defaults>
</compile_context>

<pallas_src>
import functools

import numpy as np
import jax
import jax.numpy as jnp
from jax.experimental import pallas as pl
from jax.experimental.pallas import tpu as pltpu


def _round_up(x, m):
    return ((x + m - 1) // m) * m


def _pad_last2(a, rows, cols):
    """Zero-pad the last two dims of `a` to (rows, cols); no-op pads skipped."""
    r, c = a.shape[-2], a.shape[-1]
    if r == rows and c == cols:
        return a
    pad = [(0, 0)] * (a.ndim - 2) + [(0, rows - r), (0, cols - c)]
    return jnp.pad(a, pad)


# ---------------------------------------------------------------------------
# Pallas kernels
# ---------------------------------------------------------------------------
def _fused_k_kernel(w_ref, p_ref, b_ref, o_ref):
    # Single-K-tile path: weight block index ignores (n, j) so the weight is
    # VMEM-resident across all output tiles; bias fused; direct f32 store.
    o_ref[0] = (jnp.dot(w_ref[...], p_ref[0],
                        preferred_element_type=jnp.float32)
                + b_ref[...])


def _tiled_k_kernel(w_ref, p_ref, b_ref, o_ref):
    # Large-K fallback: the output block index is invariant along k (innermost),
    # so o_ref is the resident f32 accumulator — no separate scratch needed.
    k = pl.program_id(3)

    @pl.when(k == 0)
    def _init():
        o_ref[0] = jnp.broadcast_to(b_ref[...], o_ref.shape[1:])

    o_ref[0] += jnp.dot(w_ref[...], p_ref[0],
                        preferred_element_type=jnp.float32)


# ---------------------------------------------------------------------------
# Batched matmul wrapper:  out[n] = w2d @ patches[n] + bias
# ---------------------------------------------------------------------------
def _conv_matmul(w2d, patches, bias, *, tm_max=512, tn_max=1024, tk_max=2048):
    """w2d:(Cout,K) bf16, patches:(N,K,P) bf16, bias:(Cout,1) f32 -> (N,Cout,P) f32."""
    Cout, K = w2d.shape
    N, K2, P = patches.shape
    assert K == K2

    tm = min(tm_max, _round_up(Cout, 16))    # Cout sublanes (bf16 packing)
    tk = min(tk_max, _round_up(K, 128))      # reduction tile
    tn = min(tn_max, _round_up(P, 128))      # OH*OW on lanes (lane-dense stores)
    Mp, Kp, Pp = _round_up(Cout, tm), _round_up(K, tk), _round_up(P, tn)

    wp = _pad_last2(w2d, Mp, Kp)
    pp = _pad_last2(patches, Kp, Pp)
    bp = _pad_last2(bias, Mp, 1)

    single_k = (Kp == tk)
    compiler_params = pltpu.CompilerParams(
        dimension_semantics=(("parallel", "parallel", "parallel") if single_k
                             else ("parallel", "parallel", "parallel", "arbitrary")),
        vmem_limit_bytes=48 * 1024 * 1024,
    )

    if single_k:
        out = pl.pallas_call(
            _fused_k_kernel,
            out_shape=jax.ShapeDtypeStruct((N, Mp, Pp), jnp.float32),
            grid_spec=pltpu.PrefetchScalarGridSpec(
                num_scalar_prefetch=0,
                grid=(N, Mp // tm, Pp // tn),
                in_specs=[
                    pl.BlockSpec((tm, Kp), lambda n, i, j: (i, 0)),
                    pl.BlockSpec((1, Kp, tn), lambda n, i, j: (n, 0, j)),
                    pl.BlockSpec((tm, 1), lambda n, i, j: (i, 0)),
                ],
                out_specs=pl.BlockSpec((1, tm, tn), lambda n, i, j: (n, i, j)),
            ),
            compiler_params=compiler_params,
        )(wp, pp, bp)
    else:
        out = pl.pallas_call(
            _tiled_k_kernel,
            out_shape=jax.ShapeDtypeStruct((N, Mp, Pp), jnp.float32),
            grid_spec=pltpu.PrefetchScalarGridSpec(
                num_scalar_prefetch=0,
                grid=(N, Mp // tm, Pp // tn, Kp // tk),
                in_specs=[
                    pl.BlockSpec((tm, tk), lambda n, i, j, k: (i, k)),
                    pl.BlockSpec((1, tk, tn), lambda n, i, j, k: (n, k, j)),
                    pl.BlockSpec((tm, 1), lambda n, i, j, k: (i, 0)),
                ],
                out_specs=pl.BlockSpec((1, tm, tn), lambda n, i, j, k: (n, i, j)),
            ),
            compiler_params=compiler_params,
        )(wp, pp, bp)

    return out[:, :Cout, :P]


# ---------------------------------------------------------------------------
# JAX-side glue: im2col in bf16, batched layout (N, K, OH*OW).
# ---------------------------------------------------------------------------
def _im2col_nkp(x, kh, kw, stride, padding):
    """x:(N,C,H,W) -> (N, C*kh*kw, OH*OW), dtype preserved."""
    N, C, H, W = x.shape
    if padding:
        x = jnp.pad(x, ((0, 0), (0, 0), (padding, padding), (padding, padding)))
    OH = (H + 2 * padding - kh) // stride + 1
    OW = (W + 2 * padding - kw) // stride + 1
    cols = []
    for i in range(kh):
        for j in range(kw):
            cols.append(x[:, :, i:i + stride * OH:stride,
                             j:j + stride * OW:stride])      # (N, C, OH, OW)
    patches = jnp.stack(cols, axis=2)                         # (N, C, kh*kw, OH, OW)
    return patches.reshape(N, C * kh * kw, OH * OW), OH, OW


def _fedpara_weight(T1, O1, I1, T2, O2, I2):
    # Reconstruction + Hadamard in float32 (cast to bf16 only for the matmul
    # operands) to avoid double rounding vs. the PyTorch reference.
    W1 = jnp.einsum('xyzw,xo,yi->oizw', T1, O1, I1)
    W2 = jnp.einsum('xyzw,xo,yi->oizw', T2, O2, I2)
    return W1 * W2                                            # (Cout, Cin, KH, KW)


@functools.partial(jax.jit, static_argnames=("stride", "padding"))
def fedpara_conv2d(x, T1, O1, I1, T2, O2, I2, bias=None, *, stride=1, padding=0):
    W = _fedpara_weight(T1, O1, I1, T2, O2, I2)               # f32
    Cout, Cin, KH, KW = W.shape
    N = x.shape[0]

    # bf16 im2col: cast before extraction so patches are materialized in bf16.
    patches, OH, OW = _im2col_nkp(x.astype(jnp.bfloat16), KH, KW, stride, padding)
    w2d = W.reshape(Cout, Cin * KH * KW).astype(jnp.bfloat16)

    b = (jnp.zeros((Cout,), jnp.float32) if bias is None
         else bias.astype(jnp.float32)).reshape(Cout, 1)

    out = _conv_matmul(w2d, patches, b)                       # (N, Cout, OH*OW) f32
    return out.reshape(N, Cout, OH, OW)                       # free reshape, no transpose


def _calc_low_rank(in_channels, out_channels, kernel_size, ratio):
    r1 = int(np.ceil(np.sqrt(out_channels)))
    r2 = int(np.ceil(np.sqrt(in_channels)))
    r = np.max((r1, r2))
    num_target_params = out_channels * in_channels * kernel_size ** 2 * ratio
    r3 = np.sqrt((out_channels + in_channels) ** 2 / (4 * kernel_size ** 4)
                 + num_target_params / (2 * kernel_size ** 2)) \
         - (out_channels + in_channels) / (2 * kernel_size ** 2)
    r3 = int(np.ceil(r3))
    return int(np.max((r, r3)))


if __name__ == "__main__":
    # Small shapes consistent with the module (bias=False default).
    N, Cin, H, Wsp = 2, 4, 16, 16
    Cout, ksize, stride, padding, ratio = 8, 3, 1, 1, 0.1

    low_rank = _calc_low_rank(Cin, Cout, ksize, ratio)

    key = jax.random.PRNGKey(0)
    k_t1, k_o1, k_i1, k_t2, k_o2, k_i2, k_x = jax.random.split(key, 7)

    # Mirror the PyTorch LowRank init: normal(0, gain / sqrt(fan_in)), gain=sqrt(2).
    gain = np.sqrt(2.0)
    std_t = gain / np.sqrt(low_rank * ksize * ksize)
    std_o = gain / np.sqrt(Cout)
    std_i = gain / np.sqrt(Cin)

    T1 = std_t * jax.random.normal(k_t1, (low_rank, low_rank, ksize, ksize), jnp.float32)
    O1 = std_o * jax.random.normal(k_o1, (low_rank, Cout), jnp.float32)
    I1 = std_i * jax.random.normal(k_i1, (low_rank, Cin), jnp.float32)
    T2 = std_t * jax.random.normal(k_t2, (low_rank, low_rank, ksize, ksize), jnp.float32)
    O2 = std_o * jax.random.normal(k_o2, (low_rank, Cout), jnp.float32)
    I2 = std_i * jax.random.normal(k_i2, (low_rank, Cin), jnp.float32)
    x = jax.random.normal(k_x, (N, Cin, H, Wsp), jnp.float32)

    out = fedpara_conv2d(x, T1, O1, I1, T2, O2, I2,
                         stride=stride, padding=padding)
    out = jax.block_until_ready(out)

    # Sanity check vs. XLA conv (tolerance accounts for bf16 matmul operands).
    Wfull = _fedpara_weight(T1, O1, I1, T2, O2, I2)
    ref = jax.lax.conv_general_dilated(
        x, Wfull, window_strides=(stride, stride),
        padding=[(padding, padding), (padding, padding)],
        dimension_numbers=("NCHW", "OIHW", "NCHW"))
    ref = jax.block_until_ready(ref)
    if not np.allclose(np.asarray(out), np.asarray(ref), rtol=5e-2, atol=1e-2):
        raise AssertionError("Pallas FedPara conv2d mismatch vs lax reference")

    print("KERNEL_OK")
</pallas_src>

<mosaic_0001>
module attributes {stable_mosaic.version = 11 : i64} {
  func.func @_fused_k_kernel(%arg0: i32, %arg1: i32, %arg2: i32, %arg3: memref<16x128xbf16, #tpu.memory_space<vmem>>, %arg4: memref<1x128x256xbf16, #tpu.memory_space<vmem>>, %arg5: memref<16x1xf32, #tpu.memory_space<vmem>>, %arg6: memref<1x16x256xf32, #tpu.memory_space<vmem>>) attributes {dimension_semantics = [#tpu.dimension_semantics<parallel>, #tpu.dimension_semantics<parallel>, #tpu.dimension_semantics<parallel>], iteration_bounds = array<i64: 2, 1, 1>, scalar_prefetch = 0 : i64, scratch_operands = 0 : i64, tpu.core_type = #tpu.core_type<tc>, window_params = [{transform_indices = @transform_0, window_bounds = array<i64: 16, 128>}, {transform_indices = @transform_1, window_bounds = array<i64: 1, 128, 256>}, {transform_indices = @transform_2, window_bounds = array<i64: 16, 1>}, {transform_indices = @transform_3, window_bounds = array<i64: 1, 16, 256>}]} {
    %c0 = arith.constant 0 : index
    %c0_0 = arith.constant 0 : index
    %0 = vector.load %arg3[%c0, %c0_0] : memref<16x128xbf16, #tpu.memory_space<vmem>>, vector<16x128xbf16>
    %c0_1 = arith.constant 0 : index
    %c0_2 = arith.constant 0 : index
    %c0_3 = arith.constant 0 : index
    %1 = vector.load %arg4[%c0_1, %c0_2, %c0_3] : memref<1x128x256xbf16, #tpu.memory_space<vmem>>, vector<1x128x256xbf16>
    %2 = vector.shape_cast %1 : vector<1x128x256xbf16> to vector<128x256xbf16>
    %cst = arith.constant dense<0.000000e+00> : vector<16x256xf32>
    %3 = tpu.matmul %0, %2, %cst {dimension_numbers = #tpu.dot_dimension_numbers<[1], [0], [0], [1], [0, 0, 1, 1], [], []>} : vector<16x128xbf16>, vector<128x256xbf16>, vector<16x256xf32> -> vector<16x256xf32>
    %c0_4 = arith.constant 0 : index
    %c0_5 = arith.constant 0 : index
    %4 = vector.load %arg5[%c0_4, %c0_5] : memref<16x1xf32, #tpu.memory_space<vmem>>, vector<16x1xf32>
    %5 = vector.broadcast %4 : vector<16x1xf32> to vector<16x256xf32>
    %6 = arith.addf %3, %5 : vector<16x256xf32>
    %c0_6 = arith.constant 0 : index
    %c0_7 = arith.constant 0 : index
    %c0_8 = arith.constant 0 : index
    %7 = vector.load %arg6[%c0_6, %c0_7, %c0_8] : memref<1x16x256xf32, #tpu.memory_space<vmem>>, vector<1x16x256xf32>
    %8 = vector.shape_cast %7 : vector<1x16x256xf32> to vector<16x256xf32>
    %9 = vector.shape_cast %6 : vector<16x256xf32> to vector<1x16x256xf32>
    tpu.vector_store %arg6[%c0_6, %c0_7, %c0_8], %9 {strides = array<i32>} : memref<1x16x256xf32, #tpu.memory_space<vmem>>, vector<1x16x256xf32>,
    return
  }
  func.func @transform_0(%arg0: i32, %arg1: i32, %arg2: i32) -> (i32, i32) {
    %c0_i32 = arith.constant 0 : i32
    %c0_i32_0 = arith.constant 0 : i32
    return %arg1, %c0_i32 : i32, i32
  }
  func.func @transform_1(%arg0: i32, %arg1: i32, %arg2: i32) -> (i32, i32, i32) {
    %c0_i32 = arith.constant 0 : i32
    %c0_i32_0 = arith.constant 0 : i32
    return %arg0, %c0_i32, %arg2 : i32, i32, i32
  }
  func.func @transform_2(%arg0: i32, %arg1: i32, %arg2: i32) -> (i32, i32) {
    %c0_i32 = arith.constant 0 : i32
    %c0_i32_0 = arith.constant 0 : i32
    return %arg1, %c0_i32 : i32, i32
  }
  func.func @transform_3(%arg0: i32, %arg1: i32, %arg2: i32) -> (i32, i32, i32) {
    %c0_i32 = arith.constant 0 : i32
    return %arg0, %arg1, %arg2 : i32, i32, i32
  }
}

</mosaic_0001>

<bundles_post_ra>
// kernel: fedpara_conv2d.1
= control target key start
LH: loop header
LB: loop body
LE: loop exit
PB: predicated region body
PF: predicated region fallthrough
CT: control target
= control target key end

     0   :  { %s705_s12 = smov 0   ;;  %s707_s13 = smov 0   ;;  %s769_s0 = inlined_call_operand.vmem [shape: bf16[16,128], index: 0, kind: input, shape index: {}]   ;;  %s770_s1 = inlined_call_operand.vmem [shape: bf16[2,128,256], index: 1, kind: input, shape index: {}]   ;;  %s771_s2 = inlined_call_operand.vmem [shape: f32[16,1], index: 2, kind: input, shape index: {}]   ;;  %s772_s3 = inlined_call_operand.vmem [shape: f32[2,16,256], index: 3, kind: output, shape index: {}]  }
   0x1   :  { %s709_s14 = smov 0  }
   0x2 LB: > { %s32_s15 = sadd.s32 1, %s678_s13  ;;  %p583_p0 = scmp.ge.s32.totalorder %s682_s14, 1  ;;  %s682_s14 = sphi %s709_s14, %s13_s14   ;;  %s678_s13 = sphi %s707_s13, %s774_s13   ;;  %s674_s12 = sphi %s705_s12, %s773_s12  }
   0x3   : > { %p34_p1 = scmp.ge.s32.totalorder %s32_s15, 2  ;;  %p189_p2 = scmp.lt.s32.totalorder %s682_s14, 3 }
   0x5   : > { %s776_s15 = smov (%p34_p1, %s32_s15), 0  ;;  %p190_p3 = pnand %p583_p0, %p189_p2 }
   0x6   : > { %p243_p4 = scmp.lt.s32.totalorder (!%p190_p3), %s674_s12, 1  ;;  %v684_v0 = vmov (!%p190_p3), 0   ;;  %v293_v1 = vld [vmem:[%s771_s2] sm:$0xff] (!%p190_p3)  ;;  %v294_v2 = vld [vmem:[%s771_s2 + $0x8] sm:$0xff] (!%p190_p3) }
   0x7   : > { %193 = sbr.rel (%p190_p3) target bundleno = 268 (0x10c), region = 32  ;;  %423 = vmatprep.mubr.bf16.mxu0 (!%p190_p3), %v684_v0  ;;  %634 = vset.pattern.permute.xlu0 (!%p190_p3), %v684_v0  ;;  %v659_v19 = vld [vmem:[%s769_s0] sm:$0xff] (!%p190_p3)  }
   0x8   : > { %297 = vperm.xlu0 (!%p190_p3), %634, %v293_v1  }
   0xc   : > { %302 = vperm.xlu0 (!%p190_p3), %634, %v294_v2  }
   0xe   : > { %s778_s12 = smov (!%p243_p4, %s674_s12), 1 }
   0xf   : > { %s607_s20 = sshll.u32 %s778_s12, 7  ;;  %s608_s26 = sshll.u32 %s778_s12, 5 }
  0x10   : > { %s735_s23 = scalar_lea.vmem %s770_s1, %s607_s20  ;;  %s271_s29 = scalar_lea.vmem %s772_s3, %s608_s26 }
  0x11   : > { %v635_v3 = vld [vmem:[%s735_s23 + $0x4] ss:$8 sps:$4 sm:$0xff]   ;;  %v637_v4 = vld [vmem:[%s735_s23] ss:$8 sps:$4 sm:$0xff]   ;;  %v638_v5 = vld [vmem:[%s735_s23 + $0x14] ss:$8 sps:$4 sm:$0xff]  }
  0x12   : > { %391 = vmatprep.subr.bf16.mxu0 %v635_v3  ;;  %v640_v6 = vld [vmem:[%s735_s23 + $0x10] ss:$8 sps:$4 sm:$0xff]   ;;  %v641_v7 = vld [vmem:[%s735_s23 + $0x24] ss:$8 sps:$4 sm:$0xff]   ;;  %v643_v8 = vld [vmem:[%s735_s23 + $0x20] ss:$8 sps:$4 sm:$0xff]  }
  0x13   : > { %392 = vmatpush1.bf16.msra.mxu0 %v637_v4  ;;  %v644_v9 = vld [vmem:[%s735_s23 + $0x34] ss:$8 sps:$4 sm:$0xff]   ;;  %v646_v10 = vld [vmem:[%s735_s23 + $0x30] ss:$8 sps:$4 sm:$0xff]   ;;  %v647_v11 = vld [vmem:[%s735_s23 + $0x44] ss:$8 sps:$4 sm:$0xff]  }
  0x14   : > { %393 = vmatprep.subr.bf16.mxu0 %v638_v5  ;;  %v649_v12 = vld [vmem:[%s735_s23 + $0x40] ss:$8 sps:$4 sm:$0xff]   ;;  %v650_v13 = vld [vmem:[%s735_s23 + $0x54] ss:$8 sps:$4 sm:$0xff]   ;;  %v652_v14 = vld [vmem:[%s735_s23 + $0x50] ss:$8 sps:$4 sm:$0xff]  }
  0x15   : > { %v653_v15 = vld [vmem:[%s735_s23 + $0x64] ss:$8 sps:$4 sm:$0xff]   ;;  %v655_v16 = vld [vmem:[%s735_s23 + $0x60] ss:$8 sps:$4 sm:$0xff]   ;;  %v656_v17 = vld [vmem:[%s735_s23 + $0x74] ss:$8 sps:$4 sm:$0xff]  }
  0x16   : > { %v658_v18 = vld [vmem:[%s735_s23 + $0x70] ss:$8 sps:$4 sm:$0xff]  }
  0x17   : > { %394 = vmatpush1.bf16.msra.mxu0 %v640_v6 }
  0x18   : > { %395 = vmatprep.subr.bf16.mxu0 %v641_v7 }
  0x1b   : > { %396 = vmatpush1.bf16.msra.mxu0 %v643_v8 }
  0x1c   : > { %397 = vmatprep.subr.bf16.mxu0 %v644_v9 }
  0x1f   : > { %398 = vmatpush1.bf16.msra.mxu0 %v646_v10 }
  0x20   : > { %399 = vmatprep.subr.bf16.mxu0 %v647_v11 }
  0x23   : > { %400 = vmatpush1.bf16.msra.mxu0 %v649_v12 }
  0x24   : > { %401 = vmatprep.subr.bf16.mxu0 %v650_v13 }
  0x27   : > { %402 = vmatpush1.bf16.msra.mxu0 %v652_v14 }
  0x28   : > { %403 = vmatprep.subr.bf16.mxu0 %v653_v15 }
  0x2b   : > { %404 = vmatpush1.bf16.msra.mxu0 %v655_v16 }
  0x2c   : > { %405 = vmatprep.subr.bf16.mxu0 %v656_v17 }
  0x2f   : > { %406 = vmatpush1.bf16.msra.mxu0 %v658_v18 }
  0x32   : > { %424 = vmatmul.mubr.bf16.vlgmr.msra.gmra.mrb[0].mxu0 %v659_v19 }
  0x87   : > { %v298_v20 = vpop.permute.xlu0 %297 }
  0x8b   : > { %v303_v24 = vpop.permute.xlu0 %302 }
 0x105   : > { %v425_v21 = vpop.f32.mrb[0].mxu0 }
 0x106   : > { %v426_v22 = vadd.f32 %v425_v21, %v298_v20  ;;  %v427_v23 = vpop.f32.mrb[1].mxu0 }
 0x107   : > { %v428_v25 = vadd.f32 %v427_v23, %v298_v20  ;;  %v429_v26 = vpop.f32.mrb[2].mxu0 }
 0x108   : > { %434 = vst [vmem:[%s271_s29] sm:$0xff] %v426_v22  ;;  %v430_v27 = vadd.f32 %v429_v26, %v303_v24  ;;  %v431_v28 = vpop.f32.mrb[3].mxu0 }
 0x109   : > { %435 = vst [vmem:[%s271_s29 + $0x8] sm:$0xff] %v428_v25  ;;  %v432_v29 = vadd.f32 %v431_v28, %v303_v24 }
 0x10a   : > { %436 = vst [vmem:[%s271_s29 + $0x10] sm:$0xff] %v430_v27 }
 0x10b   : > { %437 = vst [vmem:[%s271_s29 + $0x18] sm:$0xff] %v432_v29 }
 0x10c PF: > { %s13_s14 = sadd.s32 1, %s682_s14   ;;  %s773_s12 = smov %s678_s13 }
 0x10d   : > { %p10_p5 = scmp.ge.s32.totalorder %s13_s14, 4   ;;  %s774_s13 = smov %s776_s15 }
 0x10f   :  { %12 = sbr.rel (!%p10_p5) target bundleno = 2 (0x2), region = 68 }

</bundles_post_ra>
